<compile_context>
chip_gen: v7x
topology: tpu7x:2x2x1
jax: 0.10.0
libtpu: 0.0.40
codegen_flags: <defaults>
</compile_context>

<pallas_src>
import jax
import jax.numpy as jnp
from jax.experimental import pallas as pl
from jax.experimental.pallas import tpu as pltpu

BN_EPS = 1e-5
OUT_PAD = 128  # lane-dense output width; column 0 carries the result.


def _bn_relu(h, gamma, beta, inv_n):
    """Fused BatchNorm1d (batch stats, biased var) + ReLU in f32.

    Single stats pass: sum and sum-of-squares, var = E[h^2] - mean^2, then the
    normalization is applied as one scale/shift FMA pass.
    """
    s = jnp.sum(h, axis=0, keepdims=True)
    ss = jnp.sum(h * h, axis=0, keepdims=True)
    mean = s * inv_n
    var = jnp.maximum(ss * inv_n - mean * mean, 0.0)
    scale = gamma * jax.lax.rsqrt(var + BN_EPS)
    shift = beta - mean * scale
    return jnp.maximum(h * scale + shift, 0.0)


def _domain_disc_kernel(
    x_ref,                                   # (B, F)   f32 (cast to bf16 in-kernel)
    w1_ref, b1_ref, g1_ref, be1_ref,         # (F, H) bf16, (1, H) f32 x3
    w2_ref, b2_ref, g2_ref, be2_ref,         # (H, H) bf16, (1, H) f32 x3
    w3_ref, b3_ref,                          # (1, H) f32, (1, 1) f32 in SMEM
    out_ref,                                 # (B, OUT_PAD) f32, lane-dense
):
    inv_n = jnp.float32(1.0 / x_ref.shape[0])

    # ---- layer1: Linear (bf16 MXU operands, f32 accum) -> BN -> ReLU ----
    h = jnp.dot(x_ref[...].astype(jnp.bfloat16), w1_ref[...],
                preferred_element_type=jnp.float32)
    h = h + b1_ref[...]
    h = _bn_relu(h, g1_ref[...], be1_ref[...], inv_n)

    # ---- layer2: Linear (bf16 MXU operands, f32 accum) -> BN -> ReLU ----
    h = jnp.dot(h.astype(jnp.bfloat16), w2_ref[...],
                preferred_element_type=jnp.float32)
    h = h + b2_ref[...]
    h = _bn_relu(h, g2_ref[...], be2_ref[...], inv_n)

    # ---- layer3: (H -> 1) as VPU multiply + lane reduce (no N=1 MXU matmul) ----
    logits = jnp.sum(h * w3_ref[...], axis=-1, keepdims=True) + b3_ref[0, 0]
    y = jax.nn.sigmoid(logits)                       # (B, 1), EUP exp

    # Lane-dense store: replicate across 128 lanes, wrapper slices [:, :1].
    out_ref[...] = jnp.broadcast_to(y, out_ref.shape).astype(out_ref.dtype)


def domain_discriminator(x, params):
    """x: (B, in_feature) f32. Returns (B, 1) f32."""
    B, F = x.shape
    H = params["w1"].shape[1]

    # Pre-cast the (reusable) weight matrices to bf16; x is cast in-kernel.
    w1_bf = params["w1"].astype(jnp.bfloat16)
    w2_bf = params["w2"].astype(jnp.bfloat16)

    args = (
        x,
        w1_bf, params["b1"], params["g1"], params["be1"],
        w2_bf, params["b2"], params["g2"], params["be2"],
        params["w3"], params["b3"],
    )
    vmem = pl.BlockSpec(memory_space=pltpu.VMEM)
    smem = pl.BlockSpec(memory_space=pltpu.MemorySpace.SMEM)
    in_specs = [vmem] * (len(args) - 1) + [smem]     # b3 scalar -> SMEM

    # Advisory cost estimate for XLA scheduling around the custom call.
    flops = 2 * B * (F * H + H * H + H) + 12 * B * H
    transcendentals = 2 * H + B                      # rsqrt per BN col + sigmoid
    bytes_accessed = (
        x.size * 4 + w1_bf.size * 2 + w2_bf.size * 2
        + 4 * (params["w3"].size + params["b3"].size
               + params["b1"].size + params["g1"].size + params["be1"].size
               + params["b2"].size + params["g2"].size + params["be2"].size)
        + B * OUT_PAD * 4
    )

    y_padded = pl.pallas_call(
        _domain_disc_kernel,
        out_shape=jax.ShapeDtypeStruct((B, OUT_PAD), jnp.float32),
        # No grid: at these shapes the whole problem fits VMEM; each array maps
        # HBM->VMEM once as a full block. Matmuls hit the MXU, BN/ReLU run on
        # the VPU, rsqrt/sigmoid on the EUP, reductions on the XLU.
        in_specs=in_specs,
        out_specs=pl.BlockSpec(memory_space=pltpu.VMEM),
        compiler_params=pltpu.CompilerParams(vmem_limit_bytes=32 * 1024 * 1024),
        cost_estimate=pl.CostEstimate(
            flops=flops,
            transcendentals=transcendentals,
            bytes_accessed=bytes_accessed,
        ),
    )(*args)
    return y_padded[:, :1]


def init_params(key, in_feature, hidden_size):
    """Deterministic synthetic init mirroring the module's parameter shapes.
    Linear weights stored pre-transposed as (in, out); w3 stored as (1, hidden)."""
    k1, k2, k3, k4, k5, k6 = jax.random.split(key, 6)
    s1 = 1.0 / jnp.sqrt(in_feature)
    s2 = 1.0 / jnp.sqrt(hidden_size)
    return {
        "w1": jax.random.uniform(k1, (in_feature, hidden_size), jnp.float32, -s1, s1),
        "b1": jax.random.uniform(k2, (1, hidden_size), jnp.float32, -s1, s1),
        "g1": jnp.ones((1, hidden_size), jnp.float32),    # BatchNorm1d weight
        "be1": jnp.zeros((1, hidden_size), jnp.float32),  # BatchNorm1d bias
        "w2": jax.random.uniform(k3, (hidden_size, hidden_size), jnp.float32, -s2, s2),
        "b2": jax.random.uniform(k4, (1, hidden_size), jnp.float32, -s2, s2),
        "g2": jnp.ones((1, hidden_size), jnp.float32),
        "be2": jnp.zeros((1, hidden_size), jnp.float32),
        "w3": jax.random.uniform(k5, (1, hidden_size), jnp.float32, -s2, s2),
        "b3": jax.random.uniform(k6, (1, 1), jnp.float32, -s2, s2),
    }


def _bn_ref(h, g, b):
    mean = jnp.mean(h, axis=0, keepdims=True)
    var = jnp.mean((h - mean) ** 2, axis=0, keepdims=True)   # biased var
    return (h - mean) / jnp.sqrt(var + BN_EPS) * g + b


def _reference_f32(x, p):
    """Pure-f32 reference matching the PyTorch module in training mode."""
    h = jnp.maximum(_bn_ref(x @ p["w1"] + p["b1"], p["g1"], p["be1"]), 0.0)
    h = jnp.maximum(_bn_ref(h @ p["w2"] + p["b2"], p["g2"], p["be2"]), 0.0)
    logits = jnp.sum(h * p["w3"], axis=-1, keepdims=True) + p["b3"]
    return jax.nn.sigmoid(logits)


def _reference_mixed(x, p):
    """Same mixed precision as the kernel: bf16 matmul operands, f32 accum."""
    h = jnp.dot(x.astype(jnp.bfloat16), p["w1"].astype(jnp.bfloat16),
                preferred_element_type=jnp.float32) + p["b1"]
    h = jnp.maximum(_bn_ref(h, p["g1"], p["be1"]), 0.0)
    h = jnp.dot(h.astype(jnp.bfloat16), p["w2"].astype(jnp.bfloat16),
                preferred_element_type=jnp.float32) + p["b2"]
    h = jnp.maximum(_bn_ref(h, p["g2"], p["be2"]), 0.0)
    logits = jnp.sum(h * p["w3"], axis=-1, keepdims=True) + p["b3"]
    return jax.nn.sigmoid(logits)


if __name__ == "__main__":
    key = jax.random.PRNGKey(0)
    kx, kp = jax.random.split(key)

    batch, in_feature, hidden_size = 8, 16, 32
    x = jax.random.normal(kx, (batch, in_feature), jnp.float32)
    params = init_params(kp, in_feature, hidden_size)

    y = domain_discriminator(x, params)
    y = jax.block_until_ready(y)
    assert y.shape == (batch, 1)

    # Tight check against a reference using the same mixed precision.
    y_mix = _reference_mixed(x, params)
    assert jnp.allclose(y, y_mix, atol=2e-3, rtol=2e-3), (y, y_mix)

    # Sanity check against the pure-f32 PyTorch-equivalent reference
    # (bf16 MXU operands introduce a small, bounded deviation).
    y_f32 = _reference_f32(x, params)
    assert jnp.allclose(y, y_f32, atol=3e-2, rtol=3e-2), (y, y_f32)

    print("KERNEL_OK")
</pallas_src>

<mosaic_0001>
module attributes {stable_mosaic.version = 11 : i64} {
  func.func @_domain_disc_kernel(%arg0: memref<8x16xf32, #tpu.memory_space<vmem>>, %arg1: memref<16x32xbf16, #tpu.memory_space<vmem>>, %arg2: memref<1x32xf32, #tpu.memory_space<vmem>>, %arg3: memref<1x32xf32, #tpu.memory_space<vmem>>, %arg4: memref<1x32xf32, #tpu.memory_space<vmem>>, %arg5: memref<32x32xbf16, #tpu.memory_space<vmem>>, %arg6: memref<1x32xf32, #tpu.memory_space<vmem>>, %arg7: memref<1x32xf32, #tpu.memory_space<vmem>>, %arg8: memref<1x32xf32, #tpu.memory_space<vmem>>, %arg9: memref<1x32xf32, #tpu.memory_space<vmem>>, %arg10: memref<1x1xf32, #tpu.memory_space<smem>>, %arg11: memref<8x128xf32, #tpu.memory_space<vmem>>) attributes {dimension_semantics = [], scalar_prefetch = 0 : i64, scratch_operands = 0 : i64, tpu.core_type = #tpu.core_type<tc>} {
    %c0 = arith.constant 0 : index
    %c0_0 = arith.constant 0 : index
    %0 = vector.load %arg0[%c0, %c0_0] : memref<8x16xf32, #tpu.memory_space<vmem>>, vector<8x16xf32>
    %1 = arith.truncf %0 : vector<8x16xf32> to vector<8x16xbf16>
    %c0_1 = arith.constant 0 : index
    %c0_2 = arith.constant 0 : index
    %2 = vector.load %arg1[%c0_1, %c0_2] : memref<16x32xbf16, #tpu.memory_space<vmem>>, vector<16x32xbf16>
    %cst = arith.constant dense<0.000000e+00> : vector<8x32xf32>
    %3 = tpu.matmul %1, %2, %cst {dimension_numbers = #tpu.dot_dimension_numbers<[1], [0], [0], [1], [0, 0, 1, 1], [], []>} : vector<8x16xbf16>, vector<16x32xbf16>, vector<8x32xf32> -> vector<8x32xf32>
    %c0_3 = arith.constant 0 : index
    %c0_4 = arith.constant 0 : index
    %4 = vector.load %arg2[%c0_3, %c0_4] : memref<1x32xf32, #tpu.memory_space<vmem>>, vector<1x32xf32>
    %5 = vector.broadcast %4 : vector<1x32xf32> to vector<8x32xf32>
    %6 = arith.addf %3, %5 : vector<8x32xf32>
    %c0_5 = arith.constant 0 : index
    %c0_6 = arith.constant 0 : index
    %7 = vector.load %arg3[%c0_5, %c0_6] : memref<1x32xf32, #tpu.memory_space<vmem>>, vector<1x32xf32>
    %c0_7 = arith.constant 0 : index
    %c0_8 = arith.constant 0 : index
    %8 = vector.load %arg4[%c0_7, %c0_8] : memref<1x32xf32, #tpu.memory_space<vmem>>, vector<1x32xf32>
    %cst_9 = arith.constant dense<0.000000e+00> : vector<32xf32>
    %9 = vector.multi_reduction <add>, %6, %cst_9 [0] : vector<8x32xf32> to vector<32xf32>
    %10 = vector.shape_cast %9 : vector<32xf32> to vector<1x32xf32>
    %11 = arith.mulf %6, %6 : vector<8x32xf32>
    %cst_10 = arith.constant dense<0.000000e+00> : vector<32xf32>
    %12 = vector.multi_reduction <add>, %11, %cst_10 [0] : vector<8x32xf32> to vector<32xf32>
    %13 = vector.shape_cast %12 : vector<32xf32> to vector<1x32xf32>
    %cst_11 = arith.constant 1.250000e-01 : f32
    %14 = vector.broadcast %cst_11 : f32 to vector<1x32xf32>
    %15 = arith.mulf %10, %14 : vector<1x32xf32>
    %cst_12 = arith.constant 1.250000e-01 : f32
    %16 = vector.broadcast %cst_12 : f32 to vector<1x32xf32>
    %17 = arith.mulf %13, %16 : vector<1x32xf32>
    %18 = arith.mulf %15, %15 : vector<1x32xf32>
    %19 = arith.subf %17, %18 : vector<1x32xf32>
    %cst_13 = arith.constant 0.000000e+00 : f32
    %20 = vector.broadcast %cst_13 : f32 to vector<1x32xf32>
    %21 = arith.maximumf %19, %20 : vector<1x32xf32>
    %cst_14 = arith.constant 9.99999974E-6 : f32
    %22 = vector.broadcast %cst_14 : f32 to vector<1x32xf32>
    %23 = arith.addf %21, %22 : vector<1x32xf32>
    %24 = math.rsqrt %23 : vector<1x32xf32>
    %25 = arith.mulf %7, %24 : vector<1x32xf32>
    %26 = arith.mulf %15, %25 : vector<1x32xf32>
    %27 = arith.subf %8, %26 : vector<1x32xf32>
    %28 = vector.broadcast %25 : vector<1x32xf32> to vector<8x32xf32>
    %29 = arith.mulf %6, %28 : vector<8x32xf32>
    %30 = vector.broadcast %27 : vector<1x32xf32> to vector<8x32xf32>
    %31 = arith.addf %29, %30 : vector<8x32xf32>
    %cst_15 = arith.constant 0.000000e+00 : f32
    %32 = vector.broadcast %cst_15 : f32 to vector<8x32xf32>
    %33 = arith.maximumf %31, %32 : vector<8x32xf32>
    %34 = arith.truncf %33 : vector<8x32xf32> to vector<8x32xbf16>
    %c0_16 = arith.constant 0 : index
    %c0_17 = arith.constant 0 : index
    %35 = vector.load %arg5[%c0_16, %c0_17] : memref<32x32xbf16, #tpu.memory_space<vmem>>, vector<32x32xbf16>
    %cst_18 = arith.constant dense<0.000000e+00> : vector<8x32xf32>
    %36 = tpu.matmul %34, %35, %cst_18 {dimension_numbers = #tpu.dot_dimension_numbers<[1], [0], [0], [1], [0, 0, 1, 1], [], []>} : vector<8x32xbf16>, vector<32x32xbf16>, vector<8x32xf32> -> vector<8x32xf32>
    %c0_19 = arith.constant 0 : index
    %c0_20 = arith.constant 0 : index
    %37 = vector.load %arg6[%c0_19, %c0_20] : memref<1x32xf32, #tpu.memory_space<vmem>>, vector<1x32xf32>
    %38 = vector.broadcast %37 : vector<1x32xf32> to vector<8x32xf32>
    %39 = arith.addf %36, %38 : vector<8x32xf32>
    %c0_21 = arith.constant 0 : index
    %c0_22 = arith.constant 0 : index
    %40 = vector.load %arg7[%c0_21, %c0_22] : memref<1x32xf32, #tpu.memory_space<vmem>>, vector<1x32xf32>
    %c0_23 = arith.constant 0 : index
    %c0_24 = arith.constant 0 : index
    %41 = vector.load %arg8[%c0_23, %c0_24] : memref<1x32xf32, #tpu.memory_space<vmem>>, vector<1x32xf32>
    %cst_25 = arith.constant dense<0.000000e+00> : vector<32xf32>
    %42 = vector.multi_reduction <add>, %39, %cst_25 [0] : vector<8x32xf32> to vector<32xf32>
    %43 = vector.shape_cast %42 : vector<32xf32> to vector<1x32xf32>
    %44 = arith.mulf %39, %39 : vector<8x32xf32>
    %cst_26 = arith.constant dense<0.000000e+00> : vector<32xf32>
    %45 = vector.multi_reduction <add>, %44, %cst_26 [0] : vector<8x32xf32> to vector<32xf32>
    %46 = vector.shape_cast %45 : vector<32xf32> to vector<1x32xf32>
    %cst_27 = arith.constant 1.250000e-01 : f32
    %47 = vector.broadcast %cst_27 : f32 to vector<1x32xf32>
    %48 = arith.mulf %43, %47 : vector<1x32xf32>
    %cst_28 = arith.constant 1.250000e-01 : f32
    %49 = vector.broadcast %cst_28 : f32 to vector<1x32xf32>
    %50 = arith.mulf %46, %49 : vector<1x32xf32>
    %51 = arith.mulf %48, %48 : vector<1x32xf32>
    %52 = arith.subf %50, %51 : vector<1x32xf32>
    %cst_29 = arith.constant 0.000000e+00 : f32
    %53 = vector.broadcast %cst_29 : f32 to vector<1x32xf32>
    %54 = arith.maximumf %52, %53 : vector<1x32xf32>
    %cst_30 = arith.constant 9.99999974E-6 : f32
    %55 = vector.broadcast %cst_30 : f32 to vector<1x32xf32>
    %56 = arith.addf %54, %55 : vector<1x32xf32>
    %57 = math.rsqrt %56 : vector<1x32xf32>
    %58 = arith.mulf %40, %57 : vector<1x32xf32>
    %59 = arith.mulf %48, %58 : vector<1x32xf32>
    %60 = arith.subf %41, %59 : vector<1x32xf32>
    %61 = vector.broadcast %58 : vector<1x32xf32> to vector<8x32xf32>
    %62 = arith.mulf %39, %61 : vector<8x32xf32>
    %63 = vector.broadcast %60 : vector<1x32xf32> to vector<8x32xf32>
    %64 = arith.addf %62, %63 : vector<8x32xf32>
    %cst_31 = arith.constant 0.000000e+00 : f32
    %65 = vector.broadcast %cst_31 : f32 to vector<8x32xf32>
    %66 = arith.maximumf %64, %65 : vector<8x32xf32>
    %c0_32 = arith.constant 0 : index
    %c0_33 = arith.constant 0 : index
    %67 = vector.load %arg9[%c0_32, %c0_33] : memref<1x32xf32, #tpu.memory_space<vmem>>, vector<1x32xf32>
    %68 = vector.broadcast %67 : vector<1x32xf32> to vector<8x32xf32>
    %69 = arith.mulf %66, %68 : vector<8x32xf32>
    %cst_34 = arith.constant dense<0.000000e+00> : vector<8xf32>
    %70 = vector.multi_reduction <add>, %69, %cst_34 [1] : vector<8x32xf32> to vector<8xf32>
    %71 = vector.shape_cast %70 : vector<8xf32> to vector<8x1xf32>
    %c0_35 = arith.constant 0 : index
    %c0_36 = arith.constant 0 : index
    %72 = memref.load %arg10[%c0_35, %c0_36] : memref<1x1xf32, #tpu.memory_space<smem>>
    %73 = vector.broadcast %72 : f32 to vector<8x1xf32>
    %74 = arith.addf %71, %73 : vector<8x1xf32>
    %75 = arith.negf %74 : vector<8x1xf32>
    %76 = math.exp %75 : vector<8x1xf32>
    %cst_37 = arith.constant 1.000000e+00 : f32
    %77 = vector.broadcast %cst_37 : f32 to vector<8x1xf32>
    %78 = arith.addf %77, %76 : vector<8x1xf32>
    %79 = arith.divf %77, %78 : vector<8x1xf32>
    %80 = vector.shape_cast %79 : vector<8x1xf32> to vector<8x1xf32>
    %81 = vector.broadcast %80 : vector<8x1xf32> to vector<8x128xf32>
    %c0_38 = arith.constant 0 : index
    %c0_39 = arith.constant 0 : index
    %82 = vector.load %arg11[%c0_38, %c0_39] : memref<8x128xf32, #tpu.memory_space<vmem>>, vector<8x128xf32>
    tpu.vector_store %arg11[%c0_38, %c0_39], %81 {strides = array<i32>} : memref<8x128xf32, #tpu.memory_space<vmem>>, vector<8x128xf32>,
    return
  }
}

</mosaic_0001>

<bundles_post_ra>
// kernel: tpu_custom_call.1
= control target key start
LH: loop header
LB: loop body
LE: loop exit
PB: predicated region body
PF: predicated region fallthrough
CT: control target
= control target key end

     0   :  { %17 = vsyncpa [#allocation4], 0  ;;  %s581_s0 = inlined_call_operand.hbm [shape: f32[8,16], index: 0, kind: input, shape index: {}]   ;;  %s582_s1 = inlined_call_operand.hbm [shape: bf16[16,32], index: 1, kind: input, shape index: {}]   ;;  %s583_s2 = inlined_call_operand.vmem [shape: f32[1,32], index: 2, kind: input, shape index: {}]   ;;  %s584_s3 = inlined_call_operand.vmem [shape: f32[1,32], index: 3, kind: input, shape index: {}]   ;;  %s585_s4 = inlined_call_operand.vmem [shape: f32[1,32], index: 4, kind: input, shape index: {}]   ;;  %s586_s5 = inlined_call_operand.vmem [shape: bf16[32,32], index: 5, kind: input, shape index: {}]   ;;  %s587_s6 = inlined_call_operand.vmem [shape: f32[1,32], index: 6, kind: input, shape index: {}]   ;;  %s588_s7 = inlined_call_operand.vmem [shape: f32[1,32], index: 7, kind: input, shape index: {}]   ;;  %s589_s8 = inlined_call_operand.vmem [shape: f32[1,32], index: 8, kind: input, shape index: {}]   ;;  %s590_s9 = inlined_call_operand.vmem [shape: f32[1,32], index: 9, kind: input, shape index: {}]   ;;  %s591_s10 = inlined_call_operand.<no memory space> [shape: f32[1,1], index: 10, kind: input, shape index: {}]   ;;  %s592_s11 = inlined_call_operand.hbm [shape: f32[8,128], index: 11, kind: output, shape index: {}]  }
   0x1   :  { %18 = vsyncpa [#allocation7], 0 }
   0x2   :  { %19 = vsyncpa [#allocation5], 0  ;;  %s435_s17 = smov [#allocation3]   ;;  %s436_s19 = smov [#allocation6]  }
   0x3   :  { %s26_s18 = sshll.u32 %s435_s17, 4  ;;  %s35_s20 = sshll.u32 %s436_s19, 4  ;;  %s27_s18 = int_to_ptr.vmem [resolvable:$true] %s26_s18  ;;  %s502_s20 = int_to_ptr.vmem [resolvable:$true] %s35_s20 }
   0x4   :  { %s363_s23 = scalar_lea.hbm %s581_s0, 128 }
   0x5   :  { %p364_p0 = scmp.ne.s32.totalorder %s581_s0, %s363_s23  ;;  %p367_p1 = scmp.lt.u32.totalorder %s363_s23, %s581_s0 }
   0x7   :  { %p369_p2 = pnand %p367_p1, %p364_p0 }
   0x9   :  { %372 = shalt.err (!%p369_p2)
}
   0xa   :  { %s373_s28 = scalar_lea.vmem %s27_s18, 128  ;;  %p378_p4 = scmp.lt.s32.totalorder %s27_s18, %s27_s18 }
   0xb   :  { %p374_p3 = scmp.ne.s32.totalorder %s27_s18, %s373_s28  ;;  %p379_p5 = scmp.lt.s32.totalorder %s373_s28, %s373_s28 }
   0xd   :  { %p380_p6 = por %p379_p5, %p378_p4 }
   0xf   :  { %p381_p7 = pnand %p380_p6, %p374_p3 }
  0x11   :  { %384 = shalt.err (!%p381_p7)
}
  0x12   :  { %29 = dma.hbm_to_vmem [thread:$0]  %s581_s0, 128, %s27_s18, [#allocation4]  }
  0x13   :  { %s385_s14 = scalar_lea.hbm %s582_s1, 128 }
  0x14   :  { %p386_p8 = scmp.ne.s32.totalorder %s582_s1, %s385_s14  ;;  %p389_p9 = scmp.lt.u32.totalorder %s385_s14, %s582_s1 }
  0x16   :  { %p391_p10 = pnand %p389_p9, %p386_p8 }
  0x18   :  { %394 = shalt.err (!%p391_p10)
}
  0x19   :  { %s395_s21 = scalar_lea.vmem %s502_s20, 128  ;;  %p400_p12 = scmp.lt.s32.totalorder %s502_s20, %s502_s20 }
  0x1a   :  { %p396_p11 = scmp.ne.s32.totalorder %s502_s20, %s395_s21  ;;  %p401_p13 = scmp.lt.s32.totalorder %s395_s21, %s395_s21 }
  0x1c   :  { %p402_p0 = por %p401_p13, %p400_p12 }
  0x1e   :  { %p403_p1 = pnand %p402_p0, %p396_p11 }
  0x20   :  { %406 = shalt.err (!%p403_p1)
}
  0x21   :  { %s437_s0 = smov 64   ;;  %s438_s18 = smov 4  }
  0x22   :  { %41 = dma.hbm_to_vmem [thread:$0]  %s582_s1, 128, %s502_s20, [#allocation7], %s437_s0, %s437_s0, %s438_s18  }
  0x23   :  { %429 = dma.done.wait [#allocation4], 128  }
  0x24   :  { %430 = vsyncadd [#allocation4], 4294967168 }
  0x25   :  { %431 = dma.done.wait [#allocation7], 128  }
  0x26   :  { %432 = vsyncadd [#allocation7], 4294967168  ;;  %v439_v0 = vmov 0.0   ;;  %vm440_vm0 = vmmov 0   ;;  %v352_v1 = vld [vmem:[#allocation6] sm:$0xff]   ;;  %v67_v2 = vld [vmem:[#allocation3] sm:$0xff]  ;;  %v157_v33 = vlaneseq }
  0x27   :  { %331 = vmatprep.subr.bf16.mxu0 %v439_v0  ;;  %333 = vmatprep.mubr.msk.bf16.mxu0 %vm440_vm0, %v439_v0  ;;  %vm84_vm1 = vcmask 130048   ;;  %v68_v3 = vpack.c.bf16 %v67_v2, %v67_v2  ;;  %v353_v4 = vld [vmem:[%s586_s5] sm:$0xff]   ;;  %v354_v5 = vld [vmem:[%s586_s5 + $0x8] sm:$0xff]   ;;  %vm130_vm2 = vcmask 261120  }
  0x28   :  { %337 = vmatprep.subr.bf16.mxu1 %v439_v0  ;;  %341 = vmatprep.mubr.msk.bf16.mxu1 %vm440_vm0, %v439_v0  ;;  %v317_v6 = vld [vmem:[%s583_s2] ss:$0 sm:$0xff]  ;;  %v158_v34 = vshrl.u32 %v157_v33, 7 }
  0x29   :  { %332 = vmatpush3.bf16.msra.mxu0 %v352_v1  ;;  %338 = vmatpush3.bf16.msra.mxu1 %v353_v4  ;;  %v128_v35 = vld [vmem:[%s584_s3] sm:$0x1] }
  0x2a   :  { %339 = vmatprep.subr.bf16.mxu1 %v439_v0  ;;  %v159_v36 = vsub.s32 0, %v158_v34  ;;  %v129_v39 = vld [vmem:[%s585_s4] sm:$0x1] }
  0x2b   :  { %v320_v48 = vld [vmem:[%s587_s6] ss:$0 sm:$0xff] }
  0x2c   :  { %334 = vmatmul.mubr.msk.bf16.vlgmr.msra.gmra.mrb[0].mxu0 %vm84_vm1, %v68_v3 }
  0x2d   :  { %340 = vmatpush3.bf16.msra.mxu1 %v354_v5 }
  0xff   :  { %v122_v7 = vpop.f32.mrb[0].mxu0 }
 0x100   :  { %v123_v8 = vadd.f32 %v317_v6, %v122_v7  ;;  %v335_v9 = vpop.f32.mrb[1].mxu0 }
 0x101   :  { %v125_v10 = vpop.f32.mrb[2].mxu0 }
 0x102   :  { %v131_v11 = vsel %vm130_vm2, %v123_v8, 0.0  ;;  %v138_v12 = vmul.f32 %v123_v8, %v123_v8  ;;  %v336_v13 = vpop.f32.mrb[3].mxu0 }
 0x103   :  { %v132_v14 = vrot.slane %v131_v11, 4 }
 0x104   :  { %v139_v15 = vsel %vm130_vm2, %v138_v12, 0.0 }
 0x105   :  { %v133_v16 = vadd.f32 %v132_v14, %v131_v11  ;;  %v140_v17 = vrot.slane %v139_v15, 4  ;;  %v238_v11 = vld [vmem:[%s588_s7] sm:$0x1] }
 0x106   :  { %v239_v14 = vld [vmem:[%s589_s8] sm:$0x1]  ;;  %s441_s8 = smov [#allocation8]  }
 0x107   :  { %v134_v18 = vrot.slane %v133_v16, 2  ;;  %v141_v19 = vadd.f32 %v140_v17, %v139_v15  ;;  %s307_s17 = sshll.u32 %s441_s8, 4  ;;  %s308_s17 = int_to_ptr.vmem [resolvable:$true] %s307_s17 }
 0x108   :  { %p412_p3 = scmp.lt.s32.totalorder %s308_s17, %s308_s17 }
 0x109   :  { %v135_v20 = vadd.f32 %v134_v18, %v133_v16  ;;  %v142_v21 = vrot.slane %v141_v19, 2 }
 0x10b   :  { %v136_v22 = vrot.slane %v135_v20, 1  ;;  %v143_v23 = vadd.f32 %v142_v21, %v141_v19  ;;  %v324_v21 = vld [vmem:[%s590_s9] ss:$0 sm:$0xff]  ;;  %s407_s9 = scalar_lea.vmem %s308_s17, 128 }
 0x10c   :  { %p408_p2 = scmp.ne.s32.totalorder %s308_s17, %s407_s9  ;;  %p413_p4 = scmp.lt.s32.totalorder %s407_s9, %s407_s9 }
 0x10d   :  { %v137_v24 = vadd.f32 %v136_v22, %v135_v20  ;;  %v144_v25 = vrot.slane %v143_v23, 1 }
 0x10e   :  { %p414_p5 = por %p413_p4, %p412_p3 }
 0x10f   :  { %v145_v26 = vadd.f32 %v144_v25, %v143_v23  ;;  %v146_v27 = vmul.f32 0.125, %v137_v24  ;;  %v292_v25 = vstv %s591_s10 }
 0x110   :  { %p415_p6 = pnand %p414_p5, %p408_p2 }
 0x111   :  { %v147_v28 = vmul.f32 0.125, %v145_v26  ;;  %v148_v29 = vmul.f32 %v146_v27, %v146_v27 }
 0x113   :  { %v149_v30 = vsub.f32 %v147_v28, %v148_v29 }
 0x115   :  { %v150_v31 = vmax.f32 %v149_v30, 0.0 }
 0x117   :  { %v151_v32 = vadd.f32 1e-05, %v150_v31 }
 0x119   :  { %355 = vrsqrt.f32 %v151_v32 }
 0x123   :  { %v356_v37 = vpop.eup %355 }
 0x124   :  { %v153_v38 = vmul.f32 %v356_v37, %v128_v35 }
 0x126   :  { %v154_v40 = vmul.f32 %v153_v38, %v146_v27  ;;  %v160_v41 = vrot.slane %v153_v38, %v159_v36 }
 0x128   :  { %v155_v42 = vsub.f32 %v129_v39, %v154_v40  ;;  %v162_v43 = vmul.f32 %v160_v41, %v123_v8 }
 0x12a   :  { %v167_v44 = vrot.slane %v155_v42, %v159_v36 }
 0x12c   :  { %v169_v45 = vadd.f32 %v167_v44, %v162_v43 }
 0x12e   :  { %v170_v46 = vmax.f32 %v169_v45, 0.0 }
 0x130   :  { %v171_v47 = vpack.c.bf16 %v170_v46, %v170_v46 }
 0x132   :  { %342 = vmatmul.mubr.msk.bf16.vlgmr.msra.gmra.mrb[0].mxu1 %vm130_vm2, %v171_v47 }
 0x205   :  { %v232_v49 = vpop.f32.mrb[0].mxu1 }
 0x206   :  { %v233_v50 = vadd.f32 %v320_v48, %v232_v49  ;;  %v343_v51 = vpop.f32.mrb[1].mxu1 }
 0x207   :  { %v235_v52 = vpop.f32.mrb[2].mxu1 }
 0x208   :  { %v240_v53 = vsel %vm130_vm2, %v233_v50, 0.0  ;;  %v247_v54 = vmul.f32 %v233_v50, %v233_v50  ;;  %v344_v55 = vpop.f32.mrb[3].mxu1 }
 0x209   :  { %v241_v56 = vrot.slane %v240_v53, 4 }
 0x20a   :  { %v248_v57 = vsel %vm130_vm2, %v247_v54, 0.0 }
 0x20b   :  { %v242_v58 = vadd.f32 %v241_v56, %v240_v53  ;;  %v249_v59 = vrot.slane %v248_v57, 4 }
 0x20d   :  { %v243_v60 = vrot.slane %v242_v58, 2  ;;  %v250_v61 = vadd.f32 %v249_v59, %v248_v57 }
 0x20f   :  { %v244_v62 = vadd.f32 %v243_v60, %v242_v58  ;;  %v251_v63 = vrot.slane %v250_v61, 2 }
 0x211   :  { %v245_v0 = vrot.slane %v244_v62, 1  ;;  %v252_v1 = vadd.f32 %v251_v63, %v250_v61 }
 0x213   :  { %v246_v2 = vadd.f32 %v245_v0, %v244_v62  ;;  %v253_v3 = vrot.slane %v252_v1, 1 }
 0x215   :  { %v254_v4 = vadd.f32 %v253_v3, %v252_v1  ;;  %v255_v5 = vmul.f32 0.125, %v246_v2 }
 0x217   :  { %v256_v6 = vmul.f32 0.125, %v254_v4  ;;  %v257_v7 = vmul.f32 %v255_v5, %v255_v5 }
 0x219   :  { %v258_v8 = vsub.f32 %v256_v6, %v257_v7 }
 0x21b   :  { %v259_v9 = vmax.f32 %v258_v8, 0.0 }
 0x21d   :  { %v260_v10 = vadd.f32 1e-05, %v259_v9 }
 0x21f   :  { %357 = vrsqrt.f32 %v260_v10 }
 0x229   :  { %v358_v12 = vpop.eup %357 }
 0x22a   :  { %v262_v13 = vmul.f32 %v358_v12, %v238_v11 }
 0x22c   :  { %v269_v15 = vrot.slane %v262_v13, %v159_v36  ;;  %v263_v16 = vmul.f32 %v262_v13, %v255_v5 }
 0x22e   :  { %v264_v17 = vsub.f32 %v239_v14, %v263_v16  ;;  %v271_v18 = vmul.f32 %v269_v15, %v233_v50 }
 0x230   :  { %v276_v19 = vrot.slane %v264_v17, %v159_v36 }
 0x232   :  { %v278_v20 = vadd.f32 %v276_v19, %v271_v18 }
 0x234   :  { %v279_v22 = vmax.f32 %v278_v20, 0.0 }
 0x236   :  { %v287_v23 = vmul.f32 %v324_v21, %v279_v22 }
 0x238   :  { %v288_v24 = vsel %vm130_vm2, %v287_v23, 0.0 }
 0x239   :  { %289 = vadd.xlane.f32.xlu0 %v288_v24 }
 0x2c6   :  { %v290_v26 = vpop.xlane.xlu0 %289 }
 0x2c7   :  { %v293_v27 = vadd.f32 %v292_v25, %v290_v26 }
 0x2c9   :  { %v325_v28 = vmul.f32 -1.442695, %v293_v27 }
 0x2cb   :  { %359 = vpow2.f32 %v325_v28 }
 0x2d5   :  { %v360_v29 = vpop.eup %359 }
 0x2d6   :  { %v297_v30 = vadd.f32 1.0, %v360_v29 }
 0x2d8   :  { %361 = vrcp.f32 %v297_v30 }
 0x2e2   :  { %v362_v31 = vpop.eup %361 }
 0x2e3   :  { %300 = vst [vmem:[#allocation8] sm:$0xff] %v362_v31 }
 0x2e4   :  { %418 = shalt.err (!%p415_p6)
}
 0x2e5   :  { %s419_s21 = scalar_lea.hbm %s592_s11, 128 }
 0x2e6   :  { %p420_p7 = scmp.ne.s32.totalorder %s592_s11, %s419_s21  ;;  %p423_p8 = scmp.lt.u32.totalorder %s419_s21, %s592_s11 }
 0x2e8   :  { %p425_p9 = pnand %p423_p8, %p420_p7 }
 0x2ea   :  { %428 = shalt.err (!%p425_p9)
}
 0x2eb   :  { %310 = dma.vmem_to_hbm [thread:$0]  %s308_s17, 128, %s592_s11, [#allocation5]  }
 0x2ec   :  { %433 = dma.done.wait [#allocation5], 128  }
 0x2ed   :  { %434 = vsyncadd [#allocation5], 4294967168 }
 0x2ee   :  { %314 = vsyncpa [#allocation4], 1 }
 0x2ef   :  { %315 = vsyncpa [#allocation7], 1 }
 0x2f0   :  { %316 = vsyncpa [#allocation5], 1 }

</bundles_post_ra>
